<compile_context>
chip_gen: v5e
topology: v5e:2x2
jax: 0.10.0
libtpu: 0.0.40
codegen_flags: <defaults>
</compile_context>

<pallas_src>
import functools

import jax
import jax.numpy as jnp
from jax.experimental import pallas as pl
from jax.experimental.pallas import tpu as pltpu


def _ffn_fused_kernel(*refs, num_layers: int):
    """refs = (x, w1..wn, b1..bn, out). Chained matmuls + bias, sigmoid at end."""
    x_ref = refs[0]
    w_refs = refs[1 : 1 + num_layers]
    b_refs = refs[1 + num_layers : 1 + 2 * num_layers]
    o_ref = refs[-1]

    x = x_ref[...]
    for i in range(num_layers):
        # MXU matmul with f32 accumulator; bias add on the VPU.
        x = jnp.dot(x, w_refs[i][...], preferred_element_type=jnp.float32)
        x = x + b_refs[i][...]
    # Final sigmoid fused in-kernel (EUP), matching nn.Sigmoid after nn.Sequential.
    x = jax.nn.sigmoid(x)
    o_ref[...] = x.astype(o_ref.dtype)


def feedforward_pallas(x, params):
    """Fused forward: all Linear layers + sigmoid in one pallas_call.

    params: list of (w_t, b) with w_t of shape (in, out) and b of shape (out,).
    """
    B, din = x.shape
    num_layers = len(params)
    dout_final = params[-1][0].shape[1]

    ws = [w for (w, _) in params]
    bs = [b.reshape(1, b.shape[0]) for (_, b) in params]

    # Full-array blocks (everything resident in VMEM; no grid).
    def full_spec(shape):
        return pl.BlockSpec(shape, lambda: tuple(0 for _ in shape))

    in_specs = (
        [full_spec(x.shape)]
        + [full_spec(w.shape) for w in ws]
        + [full_spec(b.shape) for b in bs]
    )
    out_spec = full_spec((B, dout_final))

    # Advisory cost hint: 2*B*din*dout flops per layer, sigmoid transcendentals,
    # and bytes for all inputs + the single output.
    flops = sum(2 * B * w.shape[0] * w.shape[1] for w in ws)
    bytes_accessed = (
        x.size * x.dtype.itemsize
        + sum(w.size * w.dtype.itemsize for w in ws)
        + sum(b.size * b.dtype.itemsize for b in bs)
        + B * dout_final * 4
    )
    cost = pl.CostEstimate(
        flops=flops, transcendentals=B * dout_final, bytes_accessed=bytes_accessed
    )

    return pl.pallas_call(
        functools.partial(_ffn_fused_kernel, num_layers=num_layers),
        out_shape=jax.ShapeDtypeStruct((B, dout_final), jnp.float32),
        in_specs=in_specs,
        out_specs=out_spec,
        cost_estimate=cost,
    )(x, *ws, *bs)


def init_feedforward_params(key, layers):
    """Deterministic init matching torch.nn.Linear(layers[i], layers[i+1]) shapes."""
    params = []
    for i in range(len(layers) - 1):
        fan_in, fan_out = layers[i], layers[i + 1]
        key, kw, kb = jax.random.split(key, 3)
        bound = 1.0 / jnp.sqrt(jnp.float32(fan_in))  # PyTorch default uniform bound
        # Store transposed: (in, out) so the kernel does x @ Wt.
        w_t = jax.random.uniform(kw, (fan_in, fan_out), jnp.float32, -bound, bound)
        b = jax.random.uniform(kb, (fan_out,), jnp.float32, -bound, bound)
        params.append((w_t, b))
    return params


def feedforward_ref(x, params):
    for (w_t, b) in params:
        x = x @ w_t + b
    return jax.nn.sigmoid(x)


if __name__ == "__main__":
    layers = [32, 64, 48, 16]  # Feedforward(layers): 3 Linear layers + final sigmoid
    batch = 16

    key = jax.random.PRNGKey(0)
    key, kx = jax.random.split(key)
    x = jax.random.normal(kx, (batch, layers[0]), jnp.float32)

    params = init_feedforward_params(key, layers)

    out = feedforward_pallas(x, params)
    out = jax.block_until_ready(out)

    ref = feedforward_ref(x, params)
    assert out.shape == (batch, layers[-1])
    assert jnp.allclose(out, ref, atol=1e-5, rtol=1e-5), "mismatch vs JAX reference"

    print("KERNEL_OK")
</pallas_src>

<mosaic_0001>
module attributes {stable_mosaic.version = 11 : i64} {
  func.func @_ffn_fused_kernel(%arg0: memref<16x32xf32, #tpu.memory_space<vmem>>, %arg1: memref<32x64xf32, #tpu.memory_space<vmem>>, %arg2: memref<64x48xf32, #tpu.memory_space<vmem>>, %arg3: memref<48x16xf32, #tpu.memory_space<vmem>>, %arg4: memref<1x64xf32, #tpu.memory_space<vmem>>, %arg5: memref<1x48xf32, #tpu.memory_space<vmem>>, %arg6: memref<1x16xf32, #tpu.memory_space<vmem>>, %arg7: memref<16x16xf32, #tpu.memory_space<vmem>>) attributes {dimension_semantics = [], scalar_prefetch = 0 : i64, scratch_operands = 0 : i64, tpu.core_type = #tpu.core_type<tc>} {
    %c0 = arith.constant 0 : index
    %c0_0 = arith.constant 0 : index
    %0 = vector.load %arg0[%c0, %c0_0] : memref<16x32xf32, #tpu.memory_space<vmem>>, vector<16x32xf32>
    %c0_1 = arith.constant 0 : index
    %c0_2 = arith.constant 0 : index
    %1 = vector.load %arg1[%c0_1, %c0_2] : memref<32x64xf32, #tpu.memory_space<vmem>>, vector<32x64xf32>
    %cst = arith.constant dense<0.000000e+00> : vector<16x64xf32>
    %2 = tpu.matmul %0, %1, %cst {dimension_numbers = #tpu.dot_dimension_numbers<[1], [0], [0], [1], [0, 0, 1, 1], [], []>} : vector<16x32xf32>, vector<32x64xf32>, vector<16x64xf32> -> vector<16x64xf32>
    %c0_3 = arith.constant 0 : index
    %c0_4 = arith.constant 0 : index
    %3 = vector.load %arg4[%c0_3, %c0_4] : memref<1x64xf32, #tpu.memory_space<vmem>>, vector<1x64xf32>
    %4 = vector.broadcast %3 : vector<1x64xf32> to vector<16x64xf32>
    %5 = arith.addf %2, %4 : vector<16x64xf32>
    %c0_5 = arith.constant 0 : index
    %c0_6 = arith.constant 0 : index
    %6 = vector.load %arg2[%c0_5, %c0_6] : memref<64x48xf32, #tpu.memory_space<vmem>>, vector<64x48xf32>
    %cst_7 = arith.constant dense<0.000000e+00> : vector<16x48xf32>
    %7 = tpu.matmul %5, %6, %cst_7 {dimension_numbers = #tpu.dot_dimension_numbers<[1], [0], [0], [1], [0, 0, 1, 1], [], []>} : vector<16x64xf32>, vector<64x48xf32>, vector<16x48xf32> -> vector<16x48xf32>
    %c0_8 = arith.constant 0 : index
    %c0_9 = arith.constant 0 : index
    %8 = vector.load %arg5[%c0_8, %c0_9] : memref<1x48xf32, #tpu.memory_space<vmem>>, vector<1x48xf32>
    %9 = vector.broadcast %8 : vector<1x48xf32> to vector<16x48xf32>
    %10 = arith.addf %7, %9 : vector<16x48xf32>
    %c0_10 = arith.constant 0 : index
    %c0_11 = arith.constant 0 : index
    %11 = vector.load %arg3[%c0_10, %c0_11] : memref<48x16xf32, #tpu.memory_space<vmem>>, vector<48x16xf32>
    %cst_12 = arith.constant dense<0.000000e+00> : vector<16x16xf32>
    %12 = tpu.matmul %10, %11, %cst_12 {dimension_numbers = #tpu.dot_dimension_numbers<[1], [0], [0], [1], [0, 0, 1, 1], [], []>} : vector<16x48xf32>, vector<48x16xf32>, vector<16x16xf32> -> vector<16x16xf32>
    %c0_13 = arith.constant 0 : index
    %c0_14 = arith.constant 0 : index
    %13 = vector.load %arg6[%c0_13, %c0_14] : memref<1x16xf32, #tpu.memory_space<vmem>>, vector<1x16xf32>
    %14 = vector.broadcast %13 : vector<1x16xf32> to vector<16x16xf32>
    %15 = arith.addf %12, %14 : vector<16x16xf32>
    %16 = arith.negf %15 : vector<16x16xf32>
    %17 = math.exp %16 : vector<16x16xf32>
    %cst_15 = arith.constant 1.000000e+00 : f32
    %18 = vector.broadcast %cst_15 : f32 to vector<16x16xf32>
    %19 = arith.addf %18, %17 : vector<16x16xf32>
    %20 = arith.divf %18, %19 : vector<16x16xf32>
    %c0_16 = arith.constant 0 : index
    %c0_17 = arith.constant 0 : index
    %21 = vector.load %arg7[%c0_16, %c0_17] : memref<16x16xf32, #tpu.memory_space<vmem>>, vector<16x16xf32>
    tpu.vector_store %arg7[%c0_16, %c0_17], %20 {strides = array<i32>} : memref<16x16xf32, #tpu.memory_space<vmem>>, vector<16x16xf32>,
    return
  }
}

</mosaic_0001>

<bundles_post_ra>
// kernel: tpu_custom_call.1
= control target key start
LH: loop header
LB: loop body
LE: loop exit
PB: predicated region body
PF: predicated region fallthrough
CT: control target
= control target key end

     0   :  { %vm37_vm0 = vcmask 261120   ;;  %s383_s0 = inlined_call_operand.vmem [shape: f32[16,32], index: 0, kind: input, shape index: {}]   ;;  %s384_s1 = inlined_call_operand.vmem [shape: f32[32,64], index: 1, kind: input, shape index: {}]   ;;  %s385_s2 = inlined_call_operand.vmem [shape: f32[64,48], index: 2, kind: input, shape index: {}]   ;;  %s386_s3 = inlined_call_operand.vmem [shape: f32[48,16], index: 3, kind: input, shape index: {}]   ;;  %s387_s4 = inlined_call_operand.vmem [shape: f32[1,64], index: 4, kind: input, shape index: {}]   ;;  %s388_s5 = inlined_call_operand.vmem [shape: f32[1,48], index: 5, kind: input, shape index: {}]   ;;  %s389_s6 = inlined_call_operand.vmem [shape: f32[1,16], index: 6, kind: input, shape index: {}]   ;;  %s390_s7 = inlined_call_operand.hbm [shape: f32[16,16], index: 7, kind: output, shape index: {}]  }
   0x1   :  { %v32_v0 = vld [vmem:[%s384_s1 + $0x18] sm:$0xff]  ;;  %v31_v1 = vld [vmem:[%s384_s1 + $0x10] sm:$0xff]  ;;  %v30_v2 = vld [vmem:[%s384_s1 + $0x8] sm:$0xff] }
   0x2   :  { %56 = vmatpush.msra.mxu0 %v32_v0  ;;  %v74_v3 = vld [vmem:[%s385_s2 + $0x38] sm:$0xff]  ;;  %v73_v4 = vld [vmem:[%s385_s2 + $0x30] sm:$0xff]  ;;  %v29_v5 = vld [vmem:[%s384_s1] sm:$0xff] }
   0x3   :  { %94 = vmatpush.msra.mxu1 %v74_v3  ;;  %v72_v6 = vld [vmem:[%s385_s2 + $0x28] sm:$0xff]  ;;  %216 = vmatpush.msra.mxu3 %v74_v3  ;;  %v27_v7 = vld [vmem:[%s383_s0] sm:$0xff] }
   0x4   :  { %57 = vmatpush.msra.mxu0 %v31_v1 }
   0x5   :  { %95 = vmatpush.msra.mxu1 %v73_v4 }
   0x6   :  { %58 = vmatpush.msra.mxu0 %v30_v2 }
   0x7   :  { %12 = vsyncpa [#allocation3], 0  ;;  %v71_v8 = vld [vmem:[%s385_s2 + $0x20] sm:$0xff]  ;;  %217 = vmatpush.msra.mxu3 %v73_v4  ;;  %96 = vmatpush.msra.mxu1 %v72_v6  ;;  %v70_v9 = vld [vmem:[%s385_s2 + $0x18] sm:$0xff]  ;;  %vm79_vm1 = vcmask 523264   ;;  %vm119_vm2 = vcmask 392192  }
   0x8   :  { %59 = vmatpush.msra.mxu0 %v29_v5  ;;  %v69_v10 = vld [vmem:[%s385_s2 + $0x10] sm:$0xff]  ;;  %v28_v11 = vld [vmem:[%s383_s0 + $0x8] sm:$0xff]  ;;  %v67_v13 = vld [vmem:[%s385_s2] sm:$0xff]  ;;  %vm187_vm6 = vcmask 130048   ;;  %s196_s20 = sshll.u32 %s390_s7, 4  ;;  %s265_s21 = smov 128   ;;  %s197_s20 = int_to_ptr.hbm [resolvable:$true] %s196_s20 }
   0x9   :  { %208 = vmatmul.msk.f32.vlgmr.msra.gmra.mxu0 %vm37_vm0, %v27_v7  ;;  %218 = vmatpush.msra.mxu3 %v72_v6  ;;  %v68_v12 = vld [vmem:[%s385_s2 + $0x8] sm:$0xff]  ;;  %v113_v15 = vld [vmem:[%s386_s3 + $0x20] sm:$0xff]  ;;  %v112_v16 = vld [vmem:[%s386_s3 + $0x18] sm:$0xff]  ;;  %s266_s22 = smov 8  }
   0xa   :  { %97 = vmatpush.msra.mxu1 %v71_v8  ;;  %v114_v14 = vld [vmem:[%s386_s3 + $0x28] sm:$0xff]  ;;  %v111_v17 = vld [vmem:[%s386_s3 + $0x10] sm:$0xff]  ;;  %v227_v18 = vld [vmem:[%s387_s4] ss:$0 sm:$0xff] }
   0xb   :  { %219 = vmatpush.msra.mxu3 %v71_v8  ;;  %136 = vmatpush.msra.mxu2 %v114_v14  ;;  %v110_v23 = vld [vmem:[%s386_s3 + $0x8] sm:$0xff]  ;;  %v109_v24 = vld [vmem:[%s386_s3] sm:$0xff]  ;;  %s264_s3 = smov [#allocation2]  }
   0xc   :  { %98 = vmatpush.msra.mxu1 %v70_v9  ;;  %v228_v25 = vld [vmem:[%s388_s5] ss:$0 sm:$0xff]  ;;  %s194_s5 = sshll.u32 %s264_s3, 4  ;;  %s195_s5 = int_to_ptr.vmem [resolvable:$true] %s194_s5 }
   0xd   :  { %220 = vmatpush.msra.mxu3 %v70_v9  ;;  %137 = vmatpush.msra.mxu2 %v113_v15  ;;  %v229_v30 = vld [vmem:[%s389_s6] ss:$0 sm:$0xff] }
   0xe   :  { %99 = vmatpush.msra.mxu1 %v69_v10 }
   0xf   :  { %221 = vmatpush.msra.mxu3 %v69_v10  ;;  %138 = vmatpush.msra.mxu2 %v112_v16 }
  0x10   :  { %100 = vmatpush.msra.mxu1 %v68_v12 }
  0x11   :  { %209 = vmatmul.msk.f32.gmra.mxu0 %vm37_vm0, %v28_v11  ;;  %222 = vmatpush.msra.mxu3 %v68_v12 }
  0x12   :  { %101 = vmatpush.msra.mxu1 %v67_v13  ;;  %139 = vmatpush.msra.mxu2 %v111_v17 }
  0x13   :  { %223 = vmatpush.msra.mxu3 %v67_v13 }
  0x14   :  { %140 = vmatpush.msra.mxu2 %v110_v23 }
  0x16   :  { %141 = vmatpush.msra.mxu2 %v109_v24 }
  0x86   :  { %v61_v19 = vpop.f32.mrf.mxu0 }
  0x87   :  { %v62_v20 = vadd.f32 %v227_v18, %v61_v19 }
  0x89   :  { %210 = vmatmul.msk.f32.vlgmr.msra.gmra.mxu1 %vm79_vm1, %v62_v20 }
  0x8e   :  { %v64_v21 = vpop.f32.mrf.mxu0 }
  0x8f   :  { %v65_v22 = vadd.f32 %v227_v18, %v64_v21 }
  0x91   :  { %211 = vmatmul.msk.f32.vlgmr.msra.gmra.mxu3 %vm79_vm1, %v65_v22 }
 0x106   :  { %v103_v26 = vpop.f32.mrf.mxu1 }
 0x107   :  { %v104_v27 = vadd.f32 %v228_v25, %v103_v26 }
 0x109   :  { %212 = vmatmul.msk.f32.vlgmr.msra.gmra.mxu2 %vm119_vm2, %v104_v27 }
 0x114   :  { %v106_v28 = vpop.f32.mrf.mxu3 }
 0x115   :  { %v107_v29 = vadd.f32 %v228_v25, %v106_v28 }
 0x117   :  { %213 = vmatmul.msk.f32.gmra.mxu2 %vm119_vm2, %v107_v29 }
 0x18c   :  { %v143_v31 = vpop.f32.mrf.mxu2 }
 0x18d   :  { %v144_v32 = vadd.f32 %v229_v30, %v143_v31 }
 0x18f   :  { %v214_v33 = vmul.f32 -1.442695, %v144_v32 }
 0x191   :  { %230 = vpow2.f32 %v214_v33 }
 0x197   :  { %v231_v34 = vpop.eup %230 }
 0x198   :  { %v155_v35 = vadd.f32 1.0, %v231_v34 }
 0x19a   :  { %232 = vrcp.f32 %v155_v35  ;;  %v146_v36 = vpop.f32.mrf.mxu2  ;;  %v168_v42 = vand.u32 2147483648, %v155_v35  ;;  %v166_v45 = vand.u32 2147483647, %v155_v35  ;;  %vm162_vm4 = vweird.f32 %v155_v35 }
 0x19b   :  { %v147_v37 = vadd.f32 %v229_v30, %v146_v36 }
 0x19c   :  { %v169_v48 = vor.u32 1.1754944e-38, %v168_v42  ;;  %vm167_vm7 = vcmp.eq.f32.partialorder %v166_v45, 8.507059e+37 }
 0x19d   :  { %v215_v38 = vmul.f32 -1.442695, %v147_v37 }
 0x19f   :  { %234 = vpow2.f32 %v215_v38 }
 0x1a0   :  { %v233_v39 = vpop.eup %232 }
 0x1a1   :  { %v158_v40 = vmul.f32 %v233_v39, %v155_v35  ;;  %vm163_vm3 = vweird.f32 %v233_v39 }
 0x1a2   :  { %vm164_vm5 = vmor %vm162_vm4, %vm163_vm3 }
 0x1a3   :  { %v159_v41 = vsub.f32 1.0, %v158_v40 }
 0x1a5   :  { %v235_v43 = vpop.eup %234  ;;  %v160_v44 = vmul.f32 %v233_v39, %v159_v41 }
 0x1a6   :  { %v156_v46 = vadd.f32 1.0, %v235_v43 }
 0x1a7   :  { %v161_v47 = vadd.f32 %v233_v39, %v160_v44 }
 0x1a8   :  { %236 = vrcp.f32 %v156_v46  ;;  %v183_v54 = vand.u32 2147483648, %v156_v46  ;;  %v181_v56 = vand.u32 2147483647, %v156_v46  ;;  %vm177_vm9 = vweird.f32 %v156_v46 }
 0x1a9   :  { %v165_v49 = vsel %vm164_vm5, %v233_v39, %v161_v47 }
 0x1aa   :  { %v170_v50 = vsel %vm167_vm7, %v169_v48, %v165_v49  ;;  %v184_v58 = vor.u32 1.1754944e-38, %v183_v54  ;;  %vm182_vm11 = vcmp.eq.f32.partialorder %v181_v56, 8.507059e+37 }
 0x1ab   :  { %188 = vst.msk [vmem:[#allocation2] sm:$0xff] %vm187_vm6, %v170_v50 }
 0x1ae   :  { %v237_v51 = vpop.eup %236 }
 0x1af   :  { %v173_v52 = vmul.f32 %v237_v51, %v156_v46  ;;  %vm178_vm8 = vweird.f32 %v237_v51 }
 0x1b0   :  { %vm179_vm10 = vmor %vm177_vm9, %vm178_vm8 }
 0x1b1   :  { %v174_v53 = vsub.f32 1.0, %v173_v52 }
 0x1b3   :  { %v175_v55 = vmul.f32 %v237_v51, %v174_v53 }
 0x1b5   :  { %v176_v57 = vadd.f32 %v237_v51, %v175_v55 }
 0x1b7   :  { %v180_v59 = vsel %vm179_vm10, %v237_v51, %v176_v57 }
 0x1b8   :  { %v185_v60 = vsel %vm182_vm11, %v184_v58, %v180_v59 }
 0x1b9   :  { %189 = vst.msk [vmem:[#allocation2 + $0x8] sm:$0xff] %vm187_vm6, %v185_v60 }
 0x1ba   :  { %202 = dma.vmem_to_hbm [thread:$0]  %s195_s5, 256, %s197_s20, [#allocation3], %s265_s21, %s265_s21, %s266_s22  }
 0x1bb   :  { %262 = dma.done.wait [#allocation3], 256  }
 0x1bc   :  { %263 = vsyncadd [#allocation3], 4294967040 }
 0x1bd   :  { %207 = vsyncpa [#allocation3], 1 }

</bundles_post_ra>
